<compile_context>
chip_gen: v6e
topology: v6e:2x2x1
jax: 0.10.0
libtpu: 0.0.40
codegen_flags: <defaults>
</compile_context>

<pallas_src>
import functools

import jax
import jax.numpy as jnp
from jax import lax
from jax.experimental import pallas as pl
from jax.experimental.pallas import tpu as pltpu

EPS = 1e-5  # nn.GroupNorm default


def _lrelu(x):
    return jnp.maximum(x, 0.2 * x)


def _round_up8(n):
    return ((n + 7) // 8) * 8


def _inverted_res_kernel(x_ref, w1_ref, dw_ref, w3_ref, pv_ref, mask_ref, out_ref,
                         *, H, W, Cb, Cout):
    # x_ref:   (1, Cinp, HW) bf16  one sample, channels on sublanes, pixels on lanes
    # w1_ref:  (Cbp, Cinp)   bf16  1x1 conv #1
    # dw_ref:  (Cbp, 9)      f32   depthwise 3x3 taps, tap index = i*3+j (row-major)
    # w3_ref:  (Coutp, Cbp)  bf16  1x1 conv #2
    # pv_ref:  (Cmax, 8)     f32   packed per-channel vectors [g1,b1,dwb,g2,b2,g3,b3,0]
    # mask_ref:(9, HW)       f32   precomputed border-validity mask per tap
    HW = H * W
    Hp, Wp = H + 2, W + 2
    Cbp = w1_ref.shape[0]
    Coutp = w3_ref.shape[0]

    x = x_ref[0]                                        # (Cinp, HW) bf16
    pv = pv_ref[...]                                    # (Cmax, 8)
    g1, b1, dwb = pv[:Cbp, 0:1], pv[:Cbp, 1:2], pv[:Cbp, 2:3]
    g2, b2 = pv[:Cbp, 3:4], pv[:Cbp, 4:5]
    g3, b3 = pv[:Coutp, 5:6], pv[:Coutp, 6:7]
    dwt = dw_ref[...]                                   # (Cbp, 9)
    mask = mask_ref[...]                                # (9, HW)

    # ---- 1x1 pointwise conv (bf16 operands, f32 MXU accumulation) ----
    y = jnp.dot(w1_ref[...], x, preferred_element_type=jnp.float32)   # (Cbp, HW)

    # ---- GroupNorm(1, Cb) over the zero-padded (Cb, Hp, Wp) tensor ----
    # The padded ring of the k=1/pad=1/no-bias conv output is exactly 0, and padded
    # channels are exactly 0, so one-pass sums over the interior are the full sums.
    n1 = float(Hp * Wp * Cb)
    mean1 = jnp.sum(y) / n1
    var1 = jnp.sum(y * y) / n1 - mean1 * mean1
    scale1 = lax.rsqrt(var1 + EPS) * g1                 # (Cbp, 1)
    shift1 = b1 - mean1 * scale1                        # (Cbp, 1)
    act = _lrelu(y * scale1 + shift1)                   # interior activations (Cbp, HW)
    border = _lrelu(shift1)                             # activation of the padded ring
    act_s = act - border                                # border pixels become exactly 0

    # ---- depthwise 3x3 (valid conv over the padded tensor) via lane rolls + masks ----
    wsum = jnp.sum(dwt, axis=1, keepdims=True)          # (Cbp, 1)
    acc = jnp.broadcast_to(dwb + border * wsum, (Cbp, HW))   # bias + border contribution
    for i in range(3):
        for j in range(3):
            k = i * 3 + j
            off = (i - 1) * W + (j - 1)
            # rolled[p] = act_s[(p + off) mod HW]
            rolled = act_s if off == 0 else pltpu.roll(act_s, (-off) % HW, 1)
            if i == 1 and j == 1:
                tap = rolled                             # center tap: mask is all ones
            else:
                tap = rolled * mask[k:k + 1, :]          # zero out wrapped/border reads
            acc = acc + tap * dwt[:, k:k + 1]

    # ---- GroupNorm(1, Cb) + LeakyReLU (one-pass stats, folded affine) ----
    n2 = float(H * W * Cb)
    mean2 = jnp.sum(acc) / n2
    var2 = jnp.sum(acc * acc) / n2 - mean2 * mean2
    scale2 = lax.rsqrt(var2 + EPS) * g2
    shift2 = b2 - mean2 * scale2
    a2 = _lrelu(acc * scale2 + shift2)                  # (Cbp, HW)

    # ---- 1x1 conv to Cout (bf16 operands, f32 accumulation) ----
    z = jnp.dot(w3_ref[...], a2.astype(jnp.bfloat16),
                preferred_element_type=jnp.float32)     # (Coutp, HW)

    # ---- final GroupNorm(1, Cout); padded rows of z / g3 / b3 are exactly 0 ----
    n3 = float(H * W * Cout)
    mean3 = jnp.sum(z) / n3
    var3 = jnp.sum(z * z) / n3 - mean3 * mean3
    scale3 = lax.rsqrt(var3 + EPS) * g3
    shift3 = b3 - mean3 * scale3
    out_ref[0] = (z * scale3 + shift3).astype(out_ref.dtype)


def inverted_res_block(x_nchw, params):
    """x_nchw: (N, Cin, H, W) float32. Returns (N, Cout, H, W) float32."""
    N, Cin, H, W = x_nchw.shape
    Cb = params["w1"].shape[0]
    Cout = params["w3"].shape[0]
    HW = H * W
    Cinp, Cbp, Coutp = _round_up8(Cin), _round_up8(Cb), _round_up8(Cout)
    Cmax = max(Cbp, Coutp)

    # PyTorch weights -> kernel layouts (channels lead); zero-pad to sublane multiples;
    # 1x1-conv weights become bf16 MXU operands.
    w1_k = jnp.zeros((Cbp, Cinp), jnp.float32).at[:Cb, :Cin].set(
        params["w1"][:, :, 0, 0].astype(jnp.float32)).astype(jnp.bfloat16)
    w3_k = jnp.zeros((Coutp, Cbp), jnp.float32).at[:Cout, :Cb].set(
        params["w3"][:, :, 0, 0].astype(jnp.float32)).astype(jnp.bfloat16)
    dw_k = jnp.zeros((Cbp, 9), jnp.float32).at[:Cb].set(
        params["dww"].reshape(Cb, 9).astype(jnp.float32))

    def col(v):
        return jnp.zeros((Cmax,), jnp.float32).at[:v.shape[0]].set(
            v.astype(jnp.float32))

    pv = jnp.stack([col(params["g1"]), col(params["b1"]), col(params["dwb"]),
                    col(params["g2"]), col(params["b2"]),
                    col(params["g3"]), col(params["b3"]),
                    jnp.zeros((Cmax,), jnp.float32)], axis=1)       # (Cmax, 8)

    # Precompute the 9 depthwise border-validity masks once (trace-time constant).
    pos = jnp.arange(HW, dtype=jnp.int32)
    hh, ww = pos // W, pos % W
    rows = []
    for i in range(3):
        for j in range(3):
            dh, dw = i - 1, j - 1
            rows.append(((hh + dh >= 0) & (hh + dh < H) &
                         (ww + dw >= 0) & (ww + dw < W)).astype(jnp.float32))
    mask_f = jnp.stack(rows, axis=0)                                # (9, HW)

    # Input: NCHW flattens directly to (N, C, HW); channel-pad with zeros; bf16 storage.
    x_flat = jnp.zeros((N, Cinp, HW), jnp.float32).at[:, :Cin, :].set(
        x_nchw.reshape(N, Cin, HW).astype(jnp.float32)).astype(jnp.bfloat16)

    kernel = functools.partial(_inverted_res_kernel, H=H, W=W, Cb=Cb, Cout=Cout)
    const2d = lambda shape: pl.BlockSpec(shape, lambda n: (0, 0))

    out = pl.pallas_call(
        kernel,
        out_shape=jax.ShapeDtypeStruct((N, Coutp, HW), jnp.float32),
        grid_spec=pltpu.PrefetchScalarGridSpec(
            num_scalar_prefetch=0,
            grid=(N,),
            in_specs=[
                pl.BlockSpec((1, Cinp, HW), lambda n: (n, 0, 0)),   # x
                const2d((Cbp, Cinp)),                               # w1 (bf16)
                const2d((Cbp, 9)),                                  # depthwise taps
                const2d((Coutp, Cbp)),                              # w3 (bf16)
                const2d((Cmax, 8)),                                 # packed gn/bias vecs
                const2d((9, HW)),                                   # tap validity masks
            ],
            out_specs=pl.BlockSpec((1, Coutp, HW), lambda n: (n, 0, 0)),
        ),
        compiler_params=pltpu.CompilerParams(
            dimension_semantics=("parallel",),       # v7x: 2 TCs split the batch
            vmem_limit_bytes=64 * 1024 * 1024),      # headroom for larger tiles
    )(x_flat, w1_k, dw_k, w3_k, pv, mask_f)

    return out[:, :Cout, :].reshape(N, Cout, H, W)


# ---------------- pure-JAX reference (for correctness check) ----------------
def _groupnorm(x, g, b):
    m = jnp.mean(x, axis=(1, 2, 3), keepdims=True)
    v = jnp.mean((x - m) ** 2, axis=(1, 2, 3), keepdims=True)
    return (x - m) / jnp.sqrt(v + EPS) * g[None, :, None, None] + b[None, :, None, None]


def ref_forward(x, p, *, mm_round_bf16=False):
    # mm_round_bf16=True mirrors the kernel's bf16 MXU operands (f32 accumulation);
    # False is the exact f32 PyTorch semantics.
    def rb(a):
        return a.astype(jnp.bfloat16).astype(jnp.float32) if mm_round_bf16 else a

    dn = ("NCHW", "OIHW", "NCHW")
    Cb = p["w1"].shape[0]
    y = lax.conv_general_dilated(rb(x), rb(p["w1"].astype(jnp.float32)), (1, 1),
                                 ((1, 1), (1, 1)), dimension_numbers=dn)
    y = _lrelu(_groupnorm(y, p["g1"], p["b1"]))
    y = lax.conv_general_dilated(y, p["dww"], (1, 1), ((0, 0), (0, 0)),
                                 dimension_numbers=dn, feature_group_count=Cb)
    y = y + p["dwb"][None, :, None, None]
    y = _lrelu(_groupnorm(y, p["g2"], p["b2"]))
    y = lax.conv_general_dilated(rb(y), rb(p["w3"].astype(jnp.float32)), (1, 1),
                                 ((0, 0), (0, 0)), dimension_numbers=dn)
    return _groupnorm(y, p["g3"], p["b3"])


if __name__ == "__main__":
    # InvertedresBlock(in_channels=4, expansion=2.0, out_channels=6)
    N, Cin, H, W = 2, 4, 16, 16
    expansion = 2.0
    Cout = 6
    Cb = round(expansion * Cin)

    key = jax.random.PRNGKey(0)
    ks = jax.random.split(key, 12)
    x = jax.random.normal(ks[0], (N, Cin, H, W), jnp.float32)

    params = dict(
        w1=0.3 * jax.random.normal(ks[1], (Cb, Cin, 1, 1), jnp.float32),
        g1=1.0 + 0.1 * jax.random.normal(ks[2], (Cb,), jnp.float32),
        b1=0.1 * jax.random.normal(ks[3], (Cb,), jnp.float32),
        dww=0.2 * jax.random.normal(ks[4], (Cb, 1, 3, 3), jnp.float32),
        dwb=0.1 * jax.random.normal(ks[5], (Cb,), jnp.float32),
        g2=1.0 + 0.1 * jax.random.normal(ks[6], (Cb,), jnp.float32),
        b2=0.1 * jax.random.normal(ks[7], (Cb,), jnp.float32),
        w3=0.3 * jax.random.normal(ks[8], (Cout, Cb, 1, 1), jnp.float32),
        g3=1.0 + 0.1 * jax.random.normal(ks[9], (Cout,), jnp.float32),
        b3=0.1 * jax.random.normal(ks[10], (Cout,), jnp.float32),
    )

    out = inverted_res_block(x, params)
    out = jax.block_until_ready(out)
    assert out.shape == (N, Cout, H, W), out.shape

    # Tight structural check vs. a reference that uses the same bf16 MXU-operand
    # rounding (isolates kernel logic: GN stats, folded affines, depthwise taps).
    ref_bf16 = jax.block_until_ready(ref_forward(x, params, mm_round_bf16=True))
    assert jnp.allclose(out, ref_bf16, atol=5e-3, rtol=5e-3), \
        float(jnp.max(jnp.abs(out - ref_bf16)))

    # Loose sanity check vs. exact f32 PyTorch semantics (bf16 operand rounding is the
    # only approximation).
    ref_f32 = jax.block_until_ready(ref_forward(x, params, mm_round_bf16=False))
    assert jnp.allclose(out, ref_f32, atol=5e-2, rtol=5e-2), \
        float(jnp.max(jnp.abs(out - ref_f32)))

    print("KERNEL_OK")
</pallas_src>

<mosaic_0001>
module attributes {stable_mosaic.version = 11 : i64} {
  func.func @_inverted_res_kernel(%arg0: i32, %arg1: memref<1x8x256xbf16, #tpu.memory_space<vmem>>, %arg2: memref<8x8xbf16, #tpu.memory_space<vmem>>, %arg3: memref<8x9xf32, #tpu.memory_space<vmem>>, %arg4: memref<8x8xbf16, #tpu.memory_space<vmem>>, %arg5: memref<8x8xf32, #tpu.memory_space<vmem>>, %arg6: memref<9x256xf32, #tpu.memory_space<vmem>>, %arg7: memref<1x8x256xf32, #tpu.memory_space<vmem>>) attributes {dimension_semantics = [#tpu.dimension_semantics<parallel>], iteration_bounds = array<i64: 2>, scalar_prefetch = 0 : i64, scratch_operands = 0 : i64, tpu.core_type = #tpu.core_type<tc>, window_params = [{transform_indices = @transform_0, window_bounds = array<i64: 1, 8, 256>}, {pipeline_mode = #tpu.pipeline_mode<synchronous>, transform_indices = @transform_1, window_bounds = array<i64: 8, 8>}, {pipeline_mode = #tpu.pipeline_mode<synchronous>, transform_indices = @transform_2, window_bounds = array<i64: 8, 9>}, {pipeline_mode = #tpu.pipeline_mode<synchronous>, transform_indices = @transform_3, window_bounds = array<i64: 8, 8>}, {pipeline_mode = #tpu.pipeline_mode<synchronous>, transform_indices = @transform_4, window_bounds = array<i64: 8, 8>}, {pipeline_mode = #tpu.pipeline_mode<synchronous>, transform_indices = @transform_5, window_bounds = array<i64: 9, 256>}, {transform_indices = @transform_6, window_bounds = array<i64: 1, 8, 256>}]} {
    %c0 = arith.constant 0 : index
    %c0_0 = arith.constant 0 : index
    %c0_1 = arith.constant 0 : index
    %0 = vector.load %arg1[%c0, %c0_0, %c0_1] : memref<1x8x256xbf16, #tpu.memory_space<vmem>>, vector<1x8x256xbf16>
    %1 = vector.shape_cast %0 : vector<1x8x256xbf16> to vector<8x256xbf16>
    %c0_2 = arith.constant 0 : index
    %c0_3 = arith.constant 0 : index
    %2 = vector.load %arg5[%c0_2, %c0_3] : memref<8x8xf32, #tpu.memory_space<vmem>>, vector<8x8xf32>
    %3 = vector.extract_strided_slice %2 {offsets = [0, 0], sizes = [8, 1], strides = [1, 1]} : vector<8x8xf32> to vector<8x1xf32>
    %4 = vector.extract_strided_slice %2 {offsets = [0, 1], sizes = [8, 1], strides = [1, 1]} : vector<8x8xf32> to vector<8x1xf32>
    %5 = vector.extract_strided_slice %2 {offsets = [0, 2], sizes = [8, 1], strides = [1, 1]} : vector<8x8xf32> to vector<8x1xf32>
    %6 = vector.extract_strided_slice %2 {offsets = [0, 3], sizes = [8, 1], strides = [1, 1]} : vector<8x8xf32> to vector<8x1xf32>
    %7 = vector.extract_strided_slice %2 {offsets = [0, 4], sizes = [8, 1], strides = [1, 1]} : vector<8x8xf32> to vector<8x1xf32>
    %8 = vector.extract_strided_slice %2 {offsets = [0, 5], sizes = [8, 1], strides = [1, 1]} : vector<8x8xf32> to vector<8x1xf32>
    %9 = vector.extract_strided_slice %2 {offsets = [0, 6], sizes = [8, 1], strides = [1, 1]} : vector<8x8xf32> to vector<8x1xf32>
    %c0_4 = arith.constant 0 : index
    %c0_5 = arith.constant 0 : index
    %10 = vector.load %arg3[%c0_4, %c0_5] : memref<8x9xf32, #tpu.memory_space<vmem>>, vector<8x9xf32>
    %c0_6 = arith.constant 0 : index
    %c0_7 = arith.constant 0 : index
    %11 = vector.load %arg6[%c0_6, %c0_7] : memref<9x256xf32, #tpu.memory_space<vmem>>, vector<9x256xf32>
    %c0_8 = arith.constant 0 : index
    %c0_9 = arith.constant 0 : index
    %12 = vector.load %arg2[%c0_8, %c0_9] : memref<8x8xbf16, #tpu.memory_space<vmem>>, vector<8x8xbf16>
    %cst = arith.constant dense<0.000000e+00> : vector<8x256xf32>
    %13 = tpu.matmul %12, %1, %cst {dimension_numbers = #tpu.dot_dimension_numbers<[1], [0], [0], [1], [0, 0, 1, 1], [], []>} : vector<8x8xbf16>, vector<8x256xbf16>, vector<8x256xf32> -> vector<8x256xf32>
    %14 = vector.shape_cast %13 : vector<8x256xf32> to vector<1x8x256xf32>
    %cst_10 = arith.constant dense<0.000000e+00> : vector<1xf32>
    %15 = vector.multi_reduction <add>, %14, %cst_10 [1, 2] : vector<1x8x256xf32> to vector<1xf32>
    %16 = vector.shape_cast %15 : vector<1xf32> to vector<1x1x1xf32>
    %17 = vector.extract %16[0, 0, 0] : f32 from vector<1x1x1xf32>
    %cst_11 = arith.constant 2.592000e+03 : f32
    %18 = arith.divf %17, %cst_11 : f32
    %19 = arith.mulf %13, %13 : vector<8x256xf32>
    %20 = vector.shape_cast %19 : vector<8x256xf32> to vector<1x8x256xf32>
    %cst_12 = arith.constant dense<0.000000e+00> : vector<1xf32>
    %21 = vector.multi_reduction <add>, %20, %cst_12 [1, 2] : vector<1x8x256xf32> to vector<1xf32>
    %22 = vector.shape_cast %21 : vector<1xf32> to vector<1x1x1xf32>
    %23 = vector.extract %22[0, 0, 0] : f32 from vector<1x1x1xf32>
    %cst_13 = arith.constant 2.592000e+03 : f32
    %24 = arith.divf %23, %cst_13 : f32
    %25 = arith.mulf %18, %18 : f32
    %26 = arith.subf %24, %25 : f32
    %cst_14 = arith.constant 9.99999974E-6 : f32
    %27 = arith.addf %26, %cst_14 : f32
    %28 = math.rsqrt %27 : f32
    %29 = vector.broadcast %28 : f32 to vector<8x1xf32>
    %30 = arith.mulf %29, %3 : vector<8x1xf32>
    %31 = vector.broadcast %18 : f32 to vector<8x1xf32>
    %32 = arith.mulf %31, %30 : vector<8x1xf32>
    %33 = arith.subf %4, %32 : vector<8x1xf32>
    %34 = vector.broadcast %30 : vector<8x1xf32> to vector<8x256xf32>
    %35 = arith.mulf %13, %34 : vector<8x256xf32>
    %36 = vector.broadcast %33 : vector<8x1xf32> to vector<8x256xf32>
    %37 = arith.addf %35, %36 : vector<8x256xf32>
    %cst_15 = arith.constant 2.000000e-01 : f32
    %38 = vector.broadcast %cst_15 : f32 to vector<8x256xf32>
    %39 = arith.mulf %38, %37 : vector<8x256xf32>
    %40 = arith.maximumf %37, %39 : vector<8x256xf32>
    %cst_16 = arith.constant 2.000000e-01 : f32
    %41 = vector.broadcast %cst_16 : f32 to vector<8x1xf32>
    %42 = arith.mulf %41, %33 : vector<8x1xf32>
    %43 = arith.maximumf %33, %42 : vector<8x1xf32>
    %44 = vector.broadcast %43 : vector<8x1xf32> to vector<8x256xf32>
    %45 = arith.subf %40, %44 : vector<8x256xf32>
    %cst_17 = arith.constant dense<0.000000e+00> : vector<8xf32>
    %46 = vector.multi_reduction <add>, %10, %cst_17 [1] : vector<8x9xf32> to vector<8xf32>
    %47 = vector.shape_cast %46 : vector<8xf32> to vector<8x1xf32>
    %48 = arith.mulf %43, %47 : vector<8x1xf32>
    %49 = arith.addf %5, %48 : vector<8x1xf32>
    %50 = vector.shape_cast %49 : vector<8x1xf32> to vector<8x1xf32>
    %51 = vector.broadcast %50 : vector<8x1xf32> to vector<8x256xf32>
    %c17_i32 = arith.constant 17 : i32
    %52 = tpu.dynamic_rotate %45 by %c17_i32 dim 1 : vector<8x256xf32>, i32 -> vector<8x256xf32>
    %53 = vector.extract_strided_slice %11 {offsets = [0, 0], sizes = [1, 256], strides = [1, 1]} : vector<9x256xf32> to vector<1x256xf32>
    %54 = vector.broadcast %53 : vector<1x256xf32> to vector<8x256xf32>
    %55 = arith.mulf %52, %54 : vector<8x256xf32>
    %56 = vector.extract_strided_slice %10 {offsets = [0, 0], sizes = [8, 1], strides = [1, 1]} : vector<8x9xf32> to vector<8x1xf32>
    %57 = vector.broadcast %56 : vector<8x1xf32> to vector<8x256xf32>
    %58 = arith.mulf %55, %57 : vector<8x256xf32>
    %59 = arith.addf %51, %58 : vector<8x256xf32>
    %c16_i32 = arith.constant 16 : i32
    %60 = tpu.dynamic_rotate %45 by %c16_i32 dim 1 : vector<8x256xf32>, i32 -> vector<8x256xf32>
    %61 = vector.extract_strided_slice %11 {offsets = [1, 0], sizes = [1, 256], strides = [1, 1]} : vector<9x256xf32> to vector<1x256xf32>
    %62 = vector.broadcast %61 : vector<1x256xf32> to vector<8x256xf32>
    %63 = arith.mulf %60, %62 : vector<8x256xf32>
    %64 = vector.extract_strided_slice %10 {offsets = [0, 1], sizes = [8, 1], strides = [1, 1]} : vector<8x9xf32> to vector<8x1xf32>
    %65 = vector.broadcast %64 : vector<8x1xf32> to vector<8x256xf32>
    %66 = arith.mulf %63, %65 : vector<8x256xf32>
    %67 = arith.addf %59, %66 : vector<8x256xf32>
    %c15_i32 = arith.constant 15 : i32
    %68 = tpu.dynamic_rotate %45 by %c15_i32 dim 1 : vector<8x256xf32>, i32 -> vector<8x256xf32>
    %69 = vector.extract_strided_slice %11 {offsets = [2, 0], sizes = [1, 256], strides = [1, 1]} : vector<9x256xf32> to vector<1x256xf32>
    %70 = vector.broadcast %69 : vector<1x256xf32> to vector<8x256xf32>
    %71 = arith.mulf %68, %70 : vector<8x256xf32>
    %72 = vector.extract_strided_slice %10 {offsets = [0, 2], sizes = [8, 1], strides = [1, 1]} : vector<8x9xf32> to vector<8x1xf32>
    %73 = vector.broadcast %72 : vector<8x1xf32> to vector<8x256xf32>
    %74 = arith.mulf %71, %73 : vector<8x256xf32>
    %75 = arith.addf %67, %74 : vector<8x256xf32>
    %c1_i32 = arith.constant 1 : i32
    %76 = tpu.dynamic_rotate %45 by %c1_i32 dim 1 : vector<8x256xf32>, i32 -> vector<8x256xf32>
    %77 = vector.extract_strided_slice %11 {offsets = [3, 0], sizes = [1, 256], strides = [1, 1]} : vector<9x256xf32> to vector<1x256xf32>
    %78 = vector.broadcast %77 : vector<1x256xf32> to vector<8x256xf32>
    %79 = arith.mulf %76, %78 : vector<8x256xf32>
    %80 = vector.extract_strided_slice %10 {offsets = [0, 3], sizes = [8, 1], strides = [1, 1]} : vector<8x9xf32> to vector<8x1xf32>
    %81 = vector.broadcast %80 : vector<8x1xf32> to vector<8x256xf32>
    %82 = arith.mulf %79, %81 : vector<8x256xf32>
    %83 = arith.addf %75, %82 : vector<8x256xf32>
    %84 = vector.extract_strided_slice %10 {offsets = [0, 4], sizes = [8, 1], strides = [1, 1]} : vector<8x9xf32> to vector<8x1xf32>
    %85 = vector.broadcast %84 : vector<8x1xf32> to vector<8x256xf32>
    %86 = arith.mulf %45, %85 : vector<8x256xf32>
    %87 = arith.addf %83, %86 : vector<8x256xf32>
    %c255_i32 = arith.constant 255 : i32
    %88 = tpu.dynamic_rotate %45 by %c255_i32 dim 1 : vector<8x256xf32>, i32 -> vector<8x256xf32>
    %89 = vector.extract_strided_slice %11 {offsets = [5, 0], sizes = [1, 256], strides = [1, 1]} : vector<9x256xf32> to vector<1x256xf32>
    %90 = vector.broadcast %89 : vector<1x256xf32> to vector<8x256xf32>
    %91 = arith.mulf %88, %90 : vector<8x256xf32>
    %92 = vector.extract_strided_slice %10 {offsets = [0, 5], sizes = [8, 1], strides = [1, 1]} : vector<8x9xf32> to vector<8x1xf32>
    %93 = vector.broadcast %92 : vector<8x1xf32> to vector<8x256xf32>
    %94 = arith.mulf %91, %93 : vector<8x256xf32>
    %95 = arith.addf %87, %94 : vector<8x256xf32>
    %c241_i32 = arith.constant 241 : i32
    %96 = tpu.dynamic_rotate %45 by %c241_i32 dim 1 : vector<8x256xf32>, i32 -> vector<8x256xf32>
    %97 = vector.extract_strided_slice %11 {offsets = [6, 0], sizes = [1, 256], strides = [1, 1]} : vector<9x256xf32> to vector<1x256xf32>
    %98 = vector.broadcast %97 : vector<1x256xf32> to vector<8x256xf32>
    %99 = arith.mulf %96, %98 : vector<8x256xf32>
    %100 = vector.extract_strided_slice %10 {offsets = [0, 6], sizes = [8, 1], strides = [1, 1]} : vector<8x9xf32> to vector<8x1xf32>
    %101 = vector.broadcast %100 : vector<8x1xf32> to vector<8x256xf32>
    %102 = arith.mulf %99, %101 : vector<8x256xf32>
    %103 = arith.addf %95, %102 : vector<8x256xf32>
    %c240_i32 = arith.constant 240 : i32
    %104 = tpu.dynamic_rotate %45 by %c240_i32 dim 1 : vector<8x256xf32>, i32 -> vector<8x256xf32>
    %105 = vector.extract_strided_slice %11 {offsets = [7, 0], sizes = [1, 256], strides = [1, 1]} : vector<9x256xf32> to vector<1x256xf32>
    %106 = vector.broadcast %105 : vector<1x256xf32> to vector<8x256xf32>
    %107 = arith.mulf %104, %106 : vector<8x256xf32>
    %108 = vector.extract_strided_slice %10 {offsets = [0, 7], sizes = [8, 1], strides = [1, 1]} : vector<8x9xf32> to vector<8x1xf32>
    %109 = vector.broadcast %108 : vector<8x1xf32> to vector<8x256xf32>
    %110 = arith.mulf %107, %109 : vector<8x256xf32>
    %111 = arith.addf %103, %110 : vector<8x256xf32>
    %c239_i32 = arith.constant 239 : i32
    %112 = tpu.dynamic_rotate %45 by %c239_i32 dim 1 : vector<8x256xf32>, i32 -> vector<8x256xf32>
    %113 = vector.extract_strided_slice %11 {offsets = [8, 0], sizes = [1, 256], strides = [1, 1]} : vector<9x256xf32> to vector<1x256xf32>
    %114 = vector.broadcast %113 : vector<1x256xf32> to vector<8x256xf32>
    %115 = arith.mulf %112, %114 : vector<8x256xf32>
    %116 = vector.extract_strided_slice %10 {offsets = [0, 8], sizes = [8, 1], strides = [1, 1]} : vector<8x9xf32> to vector<8x1xf32>
    %117 = vector.broadcast %116 : vector<8x1xf32> to vector<8x256xf32>
    %118 = arith.mulf %115, %117 : vector<8x256xf32>
    %119 = arith.addf %111, %118 : vector<8x256xf32>
    %120 = vector.shape_cast %119 : vector<8x256xf32> to vector<1x8x256xf32>
    %cst_18 = arith.constant dense<0.000000e+00> : vector<1xf32>
    %121 = vector.multi_reduction <add>, %120, %cst_18 [1, 2] : vector<1x8x256xf32> to vector<1xf32>
    %122 = vector.shape_cast %121 : vector<1xf32> to vector<1x1x1xf32>
    %123 = vector.extract %122[0, 0, 0] : f32 from vector<1x1x1xf32>
    %cst_19 = arith.constant 2.048000e+03 : f32
    %124 = arith.divf %123, %cst_19 : f32
    %125 = arith.mulf %119, %119 : vector<8x256xf32>
    %126 = vector.shape_cast %125 : vector<8x256xf32> to vector<1x8x256xf32>
    %cst_20 = arith.constant dense<0.000000e+00> : vector<1xf32>
    %127 = vector.multi_reduction <add>, %126, %cst_20 [1, 2] : vector<1x8x256xf32> to vector<1xf32>
    %128 = vector.shape_cast %127 : vector<1xf32> to vector<1x1x1xf32>
    %129 = vector.extract %128[0, 0, 0] : f32 from vector<1x1x1xf32>
    %cst_21 = arith.constant 2.048000e+03 : f32
    %130 = arith.divf %129, %cst_21 : f32
    %131 = arith.mulf %124, %124 : f32
    %132 = arith.subf %130, %131 : f32
    %cst_22 = arith.constant 9.99999974E-6 : f32
    %133 = arith.addf %132, %cst_22 : f32
    %134 = math.rsqrt %133 : f32
    %135 = vector.broadcast %134 : f32 to vector<8x1xf32>
    %136 = arith.mulf %135, %6 : vector<8x1xf32>
    %137 = vector.broadcast %124 : f32 to vector<8x1xf32>
    %138 = arith.mulf %137, %136 : vector<8x1xf32>
    %139 = arith.subf %7, %138 : vector<8x1xf32>
    %140 = vector.broadcast %136 : vector<8x1xf32> to vector<8x256xf32>
    %141 = arith.mulf %119, %140 : vector<8x256xf32>
    %142 = vector.broadcast %139 : vector<8x1xf32> to vector<8x256xf32>
    %143 = arith.addf %141, %142 : vector<8x256xf32>
    %cst_23 = arith.constant 2.000000e-01 : f32
    %144 = vector.broadcast %cst_23 : f32 to vector<8x256xf32>
    %145 = arith.mulf %144, %143 : vector<8x256xf32>
    %146 = arith.maximumf %143, %145 : vector<8x256xf32>
    %c0_24 = arith.constant 0 : index
    %c0_25 = arith.constant 0 : index
    %147 = vector.load %arg4[%c0_24, %c0_25] : memref<8x8xbf16, #tpu.memory_space<vmem>>, vector<8x8xbf16>
    %148 = arith.truncf %146 : vector<8x256xf32> to vector<8x256xbf16>
    %cst_26 = arith.constant dense<0.000000e+00> : vector<8x256xf32>
    %149 = tpu.matmul %147, %148, %cst_26 {dimension_numbers = #tpu.dot_dimension_numbers<[1], [0], [0], [1], [0, 0, 1, 1], [], []>} : vector<8x8xbf16>, vector<8x256xbf16>, vector<8x256xf32> -> vector<8x256xf32>
    %150 = vector.shape_cast %149 : vector<8x256xf32> to vector<1x8x256xf32>
    %cst_27 = arith.constant dense<0.000000e+00> : vector<1xf32>
    %151 = vector.multi_reduction <add>, %150, %cst_27 [1, 2] : vector<1x8x256xf32> to vector<1xf32>
    %152 = vector.shape_cast %151 : vector<1xf32> to vector<1x1x1xf32>
    %153 = vector.extract %152[0, 0, 0] : f32 from vector<1x1x1xf32>
    %cst_28 = arith.constant 1.536000e+03 : f32
    %154 = arith.divf %153, %cst_28 : f32
    %155 = arith.mulf %149, %149 : vector<8x256xf32>
    %156 = vector.shape_cast %155 : vector<8x256xf32> to vector<1x8x256xf32>
    %cst_29 = arith.constant dense<0.000000e+00> : vector<1xf32>
    %157 = vector.multi_reduction <add>, %156, %cst_29 [1, 2] : vector<1x8x256xf32> to vector<1xf32>
    %158 = vector.shape_cast %157 : vector<1xf32> to vector<1x1x1xf32>
    %159 = vector.extract %158[0, 0, 0] : f32 from vector<1x1x1xf32>
    %cst_30 = arith.constant 1.536000e+03 : f32
    %160 = arith.divf %159, %cst_30 : f32
    %161 = arith.mulf %154, %154 : f32
    %162 = arith.subf %160, %161 : f32
    %cst_31 = arith.constant 9.99999974E-6 : f32
    %163 = arith.addf %162, %cst_31 : f32
    %164 = math.rsqrt %163 : f32
    %165 = vector.broadcast %164 : f32 to vector<8x1xf32>
    %166 = arith.mulf %165, %8 : vector<8x1xf32>
    %167 = vector.broadcast %154 : f32 to vector<8x1xf32>
    %168 = arith.mulf %167, %166 : vector<8x1xf32>
    %169 = arith.subf %9, %168 : vector<8x1xf32>
    %170 = vector.broadcast %166 : vector<8x1xf32> to vector<8x256xf32>
    %171 = arith.mulf %149, %170 : vector<8x256xf32>
    %172 = vector.broadcast %169 : vector<8x1xf32> to vector<8x256xf32>
    %173 = arith.addf %171, %172 : vector<8x256xf32>
    %c0_32 = arith.constant 0 : index
    %c0_33 = arith.constant 0 : index
    %c0_34 = arith.constant 0 : index
    %174 = vector.load %arg7[%c0_32, %c0_33, %c0_34] : memref<1x8x256xf32, #tpu.memory_space<vmem>>, vector<1x8x256xf32>
    %175 = vector.shape_cast %174 : vector<1x8x256xf32> to vector<8x256xf32>
    %176 = vector.shape_cast %173 : vector<8x256xf32> to vector<1x8x256xf32>
    tpu.vector_store %arg7[%c0_32, %c0_33, %c0_34], %176 {strides = array<i32>} : memref<1x8x256xf32, #tpu.memory_space<vmem>>, vector<1x8x256xf32>,
    return
  }
  func.func @transform_0(%arg0: i32) -> (i32, i32, i32) {
    %c0_i32 = arith.constant 0 : i32
    %c0_i32_0 = arith.constant 0 : i32
    %c0_i32_1 = arith.constant 0 : i32
    return %arg0, %c0_i32, %c0_i32_0 : i32, i32, i32
  }
  func.func @transform_1(%arg0: i32) -> (i32, i32) {
    %c0_i32 = arith.constant 0 : i32
    %c0_i32_0 = arith.constant 0 : i32
    %c0_i32_1 = arith.constant 0 : i32
    return %c0_i32, %c0_i32_0 : i32, i32
  }
  func.func @transform_2(%arg0: i32) -> (i32, i32) {
    %c0_i32 = arith.constant 0 : i32
    %c0_i32_0 = arith.constant 0 : i32
    %c0_i32_1 = arith.constant 0 : i32
    return %c0_i32, %c0_i32_0 : i32, i32
  }
  func.func @transform_3(%arg0: i32) -> (i32, i32) {
    %c0_i32 = arith.constant 0 : i32
    %c0_i32_0 = arith.constant 0 : i32
    %c0_i32_1 = arith.constant 0 : i32
    return %c0_i32, %c0_i32_0 : i32, i32
  }
  func.func @transform_4(%arg0: i32) -> (i32, i32) {
    %c0_i32 = arith.constant 0 : i32
    %c0_i32_0 = arith.constant 0 : i32
    %c0_i32_1 = arith.constant 0 : i32
    return %c0_i32, %c0_i32_0 : i32, i32
  }
  func.func @transform_5(%arg0: i32) -> (i32, i32) {
    %c0_i32 = arith.constant 0 : i32
    %c0_i32_0 = arith.constant 0 : i32
    %c0_i32_1 = arith.constant 0 : i32
    return %c0_i32, %c0_i32_0 : i32, i32
  }
  func.func @transform_6(%arg0: i32) -> (i32, i32, i32) {
    %c0_i32 = arith.constant 0 : i32
    %c0_i32_0 = arith.constant 0 : i32
    %c0_i32_1 = arith.constant 0 : i32
    return %arg0, %c0_i32, %c0_i32_0 : i32, i32, i32
  }
}

</mosaic_0001>

<bundles_post_ra>
// kernel: tpu_custom_call.1
= control target key start
LH: loop header
LB: loop body
LE: loop exit
PB: predicated region body
PF: predicated region fallthrough
CT: control target
= control target key end

     0   :  { %s1767_s0 = inlined_call_operand.hbm [shape: bf16[2,8,256], index: 0, kind: input, shape index: {}]   ;;  %s1768_s1 = inlined_call_operand.hbm [shape: bf16[8,8], index: 1, kind: input, shape index: {}]   ;;  %s1769_s2 = inlined_call_operand.hbm [shape: f32[8,9], index: 2, kind: input, shape index: {}]   ;;  %s1770_s3 = inlined_call_operand.vmem [shape: bf16[8,8], index: 3, kind: input, shape index: {}]   ;;  %s1771_s4 = inlined_call_operand.hbm [shape: f32[8,8], index: 4, kind: input, shape index: {}]   ;;  %s1772_s5 = inlined_call_operand.hbm [shape: f32[9,256], index: 5, kind: input, shape index: {}]   ;;  %s1773_s6 = inlined_call_operand.hbm [shape: f32[2,8,256], index: 6, kind: output, shape index: {}]  }
   0x1   :  { %1778 = sst [smem:[#allocation16_spill]] %s1768_s1 }
   0x2   :  { %11 = vsyncpa [#allocation3], 0 }
   0x3   :  { %13 = vsyncpa [#allocation3 + $0x1], 0 }
   0x4   :  { %14 = vsyncpa [#allocation6], 0 }
   0x5   :  { %15 = vsyncpa [#allocation9], 0 }
   0x6   :  { %16 = vsyncpa [#allocation4], 0 }
   0x7   :  { %18 = vsyncpa [#allocation4 + $0x1], 0  ;;  %s1425_s21 = smov 0   ;;  %s1427_s22 = smov 0  }
   0x8   :  { %s1429_s23 = smov 0   ;;  %s1431_s24 = smov 0  }
   0x9 LB: > { %s1365_s25 = smov [#allocation5]   ;;  %s1446_s27 = sadd.s32 4294967295, %s1363_s24   ;;  %s1363_s24 = sphi %s1431_s24, %s1800_s24   ;;  %s1359_s23 = sphi %s1429_s23, %s1799_s23   ;;  %s1355_s22 = sphi %s1427_s22, %s1798_s22   ;;  %s1351_s21 = sphi %s1425_s21, %s1797_s21  }
   0xa   : > { %s199_s26 = sshll.u32 %s1365_s25, 4  ;;  %p979_p0 = scmp.ge.s32.totalorder %s1363_s24, 1  ;;  %s200_s26 = int_to_ptr.vmem [resolvable:$true] %s199_s26 }
   0xb   : > { %p1774_p1 = scmp.eq.s32.totalorder %s1446_s27, 0  ;;  %p186_p2 = scmp.lt.s32.totalorder %s1363_s24, 3 }
   0xc   : > { %s1366_s29 = smov [#allocation8]   ;;  %s1367_s7 = smov [#allocation7]  }
   0xd   : > { %p1451_p3 = pnand %p979_p0, %p186_p2  ;;  %s224_s30 = sshll.u32 %s1366_s29, 4  ;;  %s225_s30 = int_to_ptr.vmem [resolvable:$true] %s224_s30 }
   0xe   : > { %s210_s8 = sshll.u32 %s1367_s7, 4  ;;  %s1368_s10 = smov [#allocation10]   ;;  %s1464_s8 = int_to_ptr.vmem [resolvable:$true] %s210_s8 }
   0xf   : > { %s1779_s28 = scalar_select %p1451_p3, 1, 0 }
  0x10   : > { %p1048_p5 = pneg %p1451_p3  ;;  %s1466_s11 = sshll.u32 %s1368_s10, 4  ;;  %s235_s11 = int_to_ptr.vmem [resolvable:$true] %s1466_s11 }
  0x11   : > { %s1170_s12 = scalar_lea.vmem %s200_s26, 64  ;;  %p1178_p11 = scmp.lt.s32.totalorder %s200_s26, %s200_s26 }
  0x12   : > { %p1460_p6 = pnand %p1048_p5, %p1774_p1  ;;  %p1171_p8 = scmp.ne.s32.totalorder %s200_s26, %s1170_s12 }
  0x13   : > { %p1179_p12 = scmp.lt.s32.totalorder %s1170_s12, %s1170_s12 }
  0x14   : > { %p1161_p7 = pneg %p1460_p6 }
  0x15   : > { %p1180_p13 = por %p1179_p12, %p1178_p11 }
  0x16   : > { %p1173_p9 = pnand %p1171_p8, %p1161_p7 }
  0x18   : > { %p1174_p10 = pneg %p1173_p9 }
  0x1a   : > { %p1181_p0 = pnand %p1180_p13, %p1174_p10 }
  0x1c   : > { %1184 = shalt.err (!%p1181_p0)
}
  0x1d   : > { %s1781_s1 = sld [smem:[#allocation16_spill]]  ;;  %s1196_s15 = scalar_lea.vmem %s225_s30, 128 }
  0x1e   : > { %p1197_p2 = scmp.ne.s32.totalorder %s225_s30, %s1196_s15  ;;  %p1204_p8 = scmp.lt.s32.totalorder %s225_s30, %s225_s30 }
  0x1f   : > { %p1205_p9 = scmp.lt.s32.totalorder %s1196_s15, %s1196_s15 }
  0x20   : > { %p1199_p5 = pnand %p1197_p2, %p1161_p7 }
  0x21   : > { %p1206_p1 = por %p1205_p9, %p1204_p8 }
  0x22   : > { %p1200_p4 = pneg %p1199_p5 }
  0x23   : > { %1051 = dma.hbm_to_vmem [thread:$0]  (!%p1460_p6), %s1781_s1, 64, %s200_s26, [#allocation6]  }
  0x24   : > { %p1207_p3 = pnand %p1206_p1, %p1200_p4 }
  0x26   : > { %1210 = shalt.err (!%p1207_p3)
}
  0x27   : > { %1057 = dma.hbm_to_vmem [thread:$0]  (!%p1460_p6), %s1771_s4, 128, %s225_s30, [#allocation9]  }
  0x28   : > { %s1222_s18 = scalar_lea.vmem %s1464_s8, 128  ;;  %p1230_p13 = scmp.lt.s32.totalorder %s1464_s8, %s1464_s8 }
  0x29   : > { %p1223_p10 = scmp.ne.s32.totalorder %s1464_s8, %s1222_s18  ;;  %p1231_p1 = scmp.lt.s32.totalorder %s1222_s18, %s1222_s18 }
  0x2b   : > { %p1225_p11 = pnand %p1223_p10, %p1161_p7  ;;  %p1232_p3 = por %p1231_p1, %p1230_p13 }
  0x2d   : > { %p1226_p12 = pneg %p1225_p11 }
  0x2f   : > { %p1233_p4 = pnand %p1232_p3, %p1226_p12 }
  0x31   : > { %1236 = shalt.err (!%p1233_p4)
}
  0x32   : > { %1054 = dma.hbm_to_vmem [thread:$0]  (!%p1460_p6), %s1769_s2, 128, %s1464_s8, [#allocation6]  }
  0x33   : > { %s1248_s25 = scalar_lea.vmem %s235_s11, 512  ;;  %p1256_p8 = scmp.lt.s32.totalorder %s235_s11, %s235_s11 }
  0x34   : > { %p1249_p0 = scmp.ne.s32.totalorder %s235_s11, %s1248_s25  ;;  %p1257_p9 = scmp.lt.s32.totalorder %s1248_s25, %s1248_s25 }
  0x36   : > { %p1251_p2 = pnand %p1249_p0, %p1161_p7  ;;  %p1258_p10 = por %p1257_p9, %p1256_p8 }
  0x38   : > { %p1252_p5 = pneg %p1251_p2 }
  0x3a   : > { %p1259_p11 = pnand %p1258_p10, %p1252_p5 }
  0x3c   : > { %1262 = shalt.err (!%p1259_p11)
}
  0x3d   : > { %s1369_s26 = smov 256   ;;  %s1370_s29 = smov 16  }
  0x3e   : > { %1060 = dma.hbm_to_vmem [thread:$0]  (!%p1460_p6), %s1772_s5, 512, %s235_s11, [#allocation9], %s1369_s26, %s1369_s26, %s1370_s29  }
  0x3f   : > { %s978_s8 = sadd.s32 4294967294, %s1363_s24   ;;  %s1510_s10 = sadd.s32 1, %s1363_s24  }
  0x40   : > { %s28_s12 = ssub.s32 %s1363_s24, %s1510_s10  ;;  %s31_s13 = sadd.s32 1, %s1359_s23 }
  0x41   : > { %p29_p7 = scmp.eq.s32.totalorder %s28_s12, 0  ;;  %p38_p12 = scmp.ne.s32.totalorder %s1359_s23, %s1355_s22 }
  0x42   : > { %p39_p13 = scmp.eq.s32.totalorder %s1363_s24, 0  ;;  %p44_p1 = scmp.ne.s32.totalorder %s1355_s22, %s1351_s21 }
  0x43   : > { %s1521_s14 = scalar_select %p29_p7, %s1359_s23, %s31_s13  }
  0x44   : > { %p1523_p3 = por %p39_p13, %p38_p12  ;;  %p1783_p4 = scmp.eq.s32.totalorder %s1446_s27, 0 }
  0x45   : > { %p173_p0 = scmp.eq.s32.totalorder %s1446_s27, 1  ;;  %p179_p2 = scmp.eq.s32.totalorder %s978_s8, 1 }
  0x46   : > { %p1529_p6 = por %p1783_p4, %p44_p1  ;;  %p1073_p5 = scmp.lt.s32.totalorder %s1363_s24, 2 }
  0x47   : > { %s248_s15 = sand.u32 1, %s1359_s23   ;;  %p1536_p8 = por %p173_p0, %p38_p12 }
  0x48   : > { %s1784_s11 = scalar_select %p1529_p6, 1, 0 }
  0x49   : > { %s1785_s16 = scalar_select %p1536_p8, 1, 0 }
  0x4a   : > { %p1540_p9 = por %p179_p2, %p44_p1  ;;  %s985_s18 = sshll.u32 %s248_s15, 3 }
  0x4b   : > { %s1008_s19 = sshll.u32 %s1363_s24, 7  ;;  %s252_s29 = scalar_lea.vmem [#allocation2], %s985_s18 }
  0x4c   : > { %s1786_s17 = scalar_select %p1540_p9, 1, 0 }
  0x4d   : > { %s1548_s26 = scalar_lea.hbm %s1767_s0, %s1008_s19  ;;  %s260_s30 = sshll.u32 %s252_s29, 4  ;;  %s261_s30 = int_to_ptr.vmem [resolvable:$true] %s260_s30 }
  0x4e   : > { %p1552_p10 = pnand %p1073_p5, %p1523_p3  ;;  %s249_s8 = scalar_lea.sflag [#allocation3], %s248_s15 }
  0x4f   : > { %s1263_s12 = scalar_lea.hbm %s1548_s26, 128  ;;  %s1268_s20 = scalar_lea.hbm %s1767_s0, 256 }
  0x50   : > { %p1264_p11 = scmp.ne.s32.totalorder %s1548_s26, %s1263_s12  ;;  %p1265_p7 = pneg %p1552_p10 }
  0x51   : > { %p1269_p1 = scmp.lt.s32.totalorder %s1548_s26, %s1767_s0  ;;  %p1270_p3 = scmp.lt.s32.totalorder %s1268_s20, %s1263_s12 }
  0x52   : > { %p1266_p12 = pnand %p1265_p7, %p1264_p11 }
  0x53   : > { %p1271_p4 = por %p1270_p3, %p1269_p1 }
  0x54   : > { %p1267_p13 = pneg %p1266_p12 }
  0x56   : > { %p1272_p0 = pnand %p1271_p4, %p1267_p13 }
  0x58   : > { %1275 = shalt.err (!%p1272_p0)
}
  0x59   : > { %s1276_s9 = scalar_lea.vmem %s261_s30, 128  ;;  %s1371_s15 = smov [#allocation2]  }
  0x5a   : > { %p1277_p2 = scmp.ne.s32.totalorder %s261_s30, %s1276_s9  ;;  %s1281_s29 = sshll.u32 %s1371_s15, 4  ;;  %s1282_s29 = int_to_ptr.vmem [resolvable:$false] %s1281_s29 }
  0x5b   : > { %s1283_s1 = scalar_lea.vmem %s1282_s29, 256  ;;  %p1284_p11 = scmp.lt.s32.totalorder %s261_s30, %s1282_s29 }
  0x5c   : > { %p1279_p5 = pnand %p1277_p2, %p1265_p7  ;;  %p1285_p12 = scmp.lt.s32.totalorder %s1283_s1, %s1276_s9 }
  0x5e   : > { %p1280_p9 = pneg %p1279_p5  ;;  %p1286_p8 = por %p1285_p12, %p1284_p11 }
  0x60   : > { %p1287_p6 = pnand %p1286_p8, %p1280_p9 }
  0x62   : > { %1290 = shalt.err (!%p1287_p6)
}
  0x63   : > { %1064 = dma.hbm_to_vmem [thread:$0]  (!%p1552_p10), %s1548_s26, 128, %s261_s30, %s249_s8  }
  0x64   : > { %p1788_p13 = scmp.ne.s32.totalorder %s1779_s28, 0 }
  0x65   : > { %s1573_s12 = sand.u32 (!%p1788_p13), 1, %s1355_s22   ;;  %p1789_p7 = scmp.ne.s32.totalorder (!%p1788_p13), %s1784_s11, 0 }
  0x66   : > { %269 = sbr.rel (%p1788_p13) target bundleno = 2298 (0x8fa), region = 44  ;;  %s989_s13 = sshll.u32 (!%p1788_p13), %s1573_s12, 3 }
  0x67   : > { %s272_s19 = scalar_lea.sflag (!%p1788_p13), [#allocation3], %s1573_s12  ;;  %s275_s20 = scalar_lea.vmem (!%p1788_p13), [#allocation2], %s989_s13 }
  0x6b   : > { %1334 = dma.done.wait (%p1789_p7), %s272_s19, 128  }
  0x6c   : > { %1336 = vsyncadd (%p1789_p7), %s272_s19, 4294967168  ;;  %p1790_p6 = scmp.eq.s32.totalorder %s1446_s27, 0 }
  0x6e   : > { %1338 = dma.done.wait (%p1790_p6), [#allocation6], 192   ;;  %p1791_p8 = pmov %p1790_p6 }
  0x6f   : > { %p1792_p9 = pmov %p1790_p6 }
  0x70   : > { %1340 = vsyncadd (%p1791_p8), [#allocation6], 4294967104 }
  0x71   : > { %1342 = dma.done.wait (%p1792_p9), [#allocation9], 640   ;;  %p1793_p10 = pmov %p1790_p6 }
  0x72   : > { %v1372_v0 = vmov 0   ;;  %v321_v1 = vld [vmem:[%s275_s20] sm:$0xff]  ;;  %vm338_vm0 = vcmask 1043456   ;;  %v328_v5 = vld [vmem:[#allocation5] sm:$0xf]  ;;  %vm334_vm1 = vcmask 64512  }
  0x73   : > { %1344 = vsyncadd (%p1793_p10), [#allocation9], 4294966656  ;;  %377 = vmatprep.mubr.bf16.mxu0 %v1372_v0  ;;  %1134 = vset.pattern.permute.xlu0 %v1372_v0  ;;  %v996_v2 = vcombine.high %v321_v1, %v321_v1  ;;  %v995_v3 = vcombine.low %v321_v1, %v321_v1  ;;  %v1605_v14 = vld [vmem:[#allocation7] sm:$0xff]  ;;  %vm456_vm2 = vcmask 72704   ;;  %v1373_v32 = vmov 1   ;;  %v1608_v33 = vld [vmem:[#allocation8] sm:$0xff] }
  0x74   : > { %787 = vmatprep.mubr.bf16.mxu1 %v1372_v0  ;;  %v457_v15 = vsel %vm456_vm2, %v1605_v14, 0.0  ;;  %1135 = vset.pattern.permute.xlu1 %v1373_v32  ;;  %s1374_s25 = smov 1   ;;  %v1375_v38 = vmov 2   ;;  %v1376_v39 = vmov 3   ;;  %v1377_v40 = vmov 4   ;;  %s1382_s9 = smov 16  }
  0x75   : > { %997 = vmatprep.subr.msk.bf16.mxu0 %vm338_vm0, %v996_v2  ;;  %v340_v4 = vsel %vm338_vm0, %v995_v3, 0  ;;  %458 = vadd.xlane.f32.xlu1 %v457_v15  ;;  %v1378_v41 = vmov 7   ;;  %v1379_v48 = vmov 5   ;;  %v1380_v49 = vmov 6   ;;  %s1383_s15 = smov 127   ;;  %s1384_s29 = smov 17  }
  0x76   : > { %360 = vmatpush1.bf16.msra.mxu0 %v340_v4  ;;  %v1381_v50 = vmov 8   ;;  %s1385_s13 = smov 113   ;;  %s1386_s19 = smov 15  }
  0x77   : > { %s1387_s20 = smov 112   ;;  %p1794_p3 = scmp.ne.s32.totalorder %s1785_s16, 0 }
  0x79   : > { %998 = vmatmul.mubr.msk.bf16.vlgmr.msra.gmra.mxu0 %vm334_vm1, %v328_v5 }
  0xfe   : > { %v459_v42 = vpop.xlane.xlu1 %458 }
 0x139   : > { %v1595_v6 = vpop.f32.mrf.mxu0 }
 0x13a   : > { %v399_v11 = vmul.f32 %v1595_v6, %v1595_v6 }
 0x13b   : > { %v1597_v7 = vpop.f32.mrf.mxu0 }
 0x13c   : > { %v386_v8 = vadd.f32 %v1597_v7, %v1595_v6  ;;  %v400_v9 = vmul.f32 %v1597_v7, %v1597_v7 }
 0x13d   : > { %v383_v10 = vpop.f32.mrf.mxu0 }
 0x13e   : > { %387 = vadd.xlane.f32.xlu0 %v386_v8  ;;  %v401_v13 = vadd.f32 %v400_v9, %v399_v11 }
 0x13f   : > { %v384_v12 = vpop.f32.mrf.mxu0 }
 0x140   : > { %v475_v12 = vlaneseq }
 0x142   : > { %402 = vadd.xlane.f32.xlu0 %v401_v13  ;;  %v1659_v15 = vshrl.u32 %v475_v12, 7 }
 0x1c7   : > { %v388_v16 = vpop.xlane.xlu0 %387 }
 0x1c8   : > { %v389_v17 = vrot.slane %v388_v16, 4 }
 0x1ca   : > { %v390_v18 = vadd.f32 %v389_v17, %v388_v16  ;;  %v1661_v16 = vand.u32 127, %v475_v12  ;;  %v616_v12 = vsub.s32 6, %v1659_v15 }
 0x1cb   : > { %v403_v19 = vpop.xlane.xlu0 %402 }
 0x1cc   : > { %v391_v20 = vrot.slane %v390_v18, 2  ;;  %v404_v21 = vrot.slane %v403_v19, 4  ;;  %vm477_vm3 = vcmp.lt.s32.totalorder %v1661_v16, 17  ;;  %vm503_vm4 = vcmp.lt.s32.totalorder %v1661_v16, 16 }
 0x1cd   : > { %vm528_vm5 = vcmp.lt.s32.totalorder %v1661_v16, 15  ;;  %vm553_vm6 = vcmp.lt.s32.totalorder %v1661_v16, 1  ;;  %vm586_vm7 = vcmp.lt.s32.totalorder %v1661_v16, 127  ;;  %vm611_vm8 = vcmp.lt.s32.totalorder %v1661_v16, 113 }
 0x1ce   : > { %v405_v22 = vadd.f32 %v404_v21, %v403_v19  ;;  %v392_v23 = vadd.f32 %v391_v20, %v390_v18  ;;  %v482_v19 = vsub.s32 0, %v1659_v15  ;;  %v1666_v20 = vld [vmem:[#allocation10] sm:$0xff]  ;;  %v1668_v21 = vld [vmem:[#allocation10 + $0x8] sm:$0xff]  ;;  %vm636_vm9 = vcmp.lt.s32.totalorder %v1661_v16, 112 }
 0x1cf   : > { %vm661_vm10 = vcmp.lt.s32.totalorder %v1661_v16, 111 }
 0x1d0   : > { %v406_v24 = vrot.slane %v405_v22, 2  ;;  %v393_v25 = vrot.slane %v392_v23, 1 }
 0x1d2   : > { %v394_v26 = vadd.f32 %v393_v25, %v392_v23  ;;  %v407_v27 = vadd.f32 %v406_v24, %v405_v22  ;;  %v508_v22 = vsub.s32 1, %v1659_v15  ;;  %v533_v23 = vsub.s32 2, %v1659_v15 }
 0x1d3   : > { %v483_v25 = vrot.slane %v1666_v20, %v482_v19 }
 0x1d4   : > { %1010 = vpush %v394_v26  ;;  %v408_v28 = vrot.slane %v407_v27, 1  ;;  %v487_v26 = vrot.slane %v1668_v21, %v482_v19 }
 0x1d6   : > { %v409_v29 = vadd.f32 %v408_v28, %v407_v27 }
 0x1d8   : > { %1012 = vpush %v409_v29 }
 0x205   : > { %s1011_s1 = spop %1010 }
 0x206   : > { %s398_s28 = smul.f32 0.00038580247, %s1011_s1  ;;  %s1388_s1 = smov 111  }
 0x208   : > { %s414_s11 = smul.f32 %s398_s28, %s398_s28  ;;  %v422_v36 = vstv %s398_s28 }
 0x209   : > { %s1013_s26 = spop %1012 }
 0x20a   : > { %s413_s30 = smul.f32 0.00038580247, %s1013_s26 }
 0x20c   : > { %s415_s7 = ssub.f32 %s413_s30, %s414_s11 }
 0x20e   : > { %s416_s8 = sadd.f32 1e-05, %s415_s7 }
 0x210   : > { %v417_v30 = vstv %s416_s8 }
 0x211   : > { %1153 = vrsqrt.f32 %v417_v30  ;;  %v509_v30 = vrot.slane %v1666_v20, %v508_v22 }
 0x21e   : > { %v1154_v31 = vpop.eup %1153 }
 0x21f   : > { %1014 = vpush %v1154_v31  ;;  %v513_v31 = vrot.slane %v1668_v21, %v508_v22 }
 0x250   : > { %s1015_s18 = spop %1014 }
 0x251   : > { %v420_v34 = vstv %s1015_s18 }
 0x252   : > { %v421_v35 = vmul.f32 %v420_v34, %v1608_v33 }
 0x254   : > { %v423_v37 = vmul.f32 %v422_v36, %v421_v35  ;;  %431 = vperm.xlu0 %1134, %v421_v35   ;;  %v534_v36 = vrot.slane %v1666_v20, %v533_v23 }
 0x256   : > { %425 = vrot.lane.b32.xlu1 %v423_v37, %s1374_s25 }
 0x258   : > { %1138 = vset.pattern.permute.xlu0 %v1375_v38 }
 0x259   : > { %542 = vperm.xlu0 %1138, %v1605_v14  }
 0x25d   : > { %1139 = vset.pattern.permute.xlu0 %v1376_v39 }
 0x25e   : > { %567 = vperm.xlu0 %1139, %v1605_v14  }
 0x262   : > { %1140 = vset.pattern.permute.xlu0 %v1377_v40 }
 0x263   : > { %575 = vperm.xlu0 %1140, %v1605_v14  }
 0x267   : > { %1143 = vset.pattern.permute.xlu0 %v1378_v41 }
 0x268   : > { %650 = vperm.xlu0 %1143, %v1605_v14  }
 0x26c   : > { %1145 = vset.pattern.permute.xlu0 %v1381_v50 }
 0x2c8   : > { %v426_v43 = vpop.permute.xlu1 %425 }
 0x2c9   : > { %v428_v44 = vsub.f32 %v1608_v33, %v426_v43 }
 0x2cb   : > { %v447_v45 = vmul.f32 0.2, %v428_v44  ;;  %438 = vperm.xlu1 %1135, %v428_v44  }
 0x2cd   : > { %v448_v46 = vmax.f32 %v428_v44, %v447_v45 }
 0x2cf   : > { %451 = vperm.xlu1 %1135, %v448_v46   ;;  %v460_v47 = vmul.f32 %v459_v42, %v448_v46  ;;  %v432_v51 = vpop.permute.xlu0 %431 }
 0x2d0   : > { %v434_v52 = vmul.f32 %v432_v51, %v1595_v6  ;;  %v435_v53 = vmul.f32 %v432_v51, %v1597_v7 }
 0x2d3   : > { %462 = vrot.lane.b32.xlu1 %v460_v47, %s1374_s25 }
 0x2d4   : > { %1136 = vset.pattern.permute.xlu1 %v1372_v0  ;;  %v543_v8 = vpop.permute.xlu0 %542 }
 0x2d7   : > { %492 = vperm.xlu1 %1136, %v1605_v14  }
 0x2d9   : > { %v1655_v10 = vpop.permute.xlu0 %567 }
 0x2db   : > { %1137 = vset.pattern.permute.xlu1 %v1373_v32  ;;  %v558_v32 = vsub.s32 3, %v1659_v15 }
 0x2dc   : > { %517 = vperm.xlu1 %1137, %v1605_v14  }
 0x2dd   : > { %v559_v45 = vrot.slane %v1666_v20, %v558_v32  ;;  %v563_v46 = vrot.slane %v1668_v21, %v558_v32 }
 0x2e0   : > { %1141 = vset.pattern.permute.xlu1 %v1379_v48 }
 0x2e1   : > { %600 = vperm.xlu1 %1141, %v1605_v14  }
 0x2e5   : > { %1142 = vset.pattern.permute.xlu1 %v1380_v49 }
 0x2e6   : > { %625 = vperm.xlu1 %1142, %v1605_v14  }
 0x2ea   : > { %1144 = vset.pattern.permute.xlu1 %v1375_v38 }
 0x346   : > { %v439_v54 = vpop.permute.xlu1 %438 }
 0x347   : > { %v441_v55 = vadd.f32 %v439_v54, %v434_v52  ;;  %v442_v56 = vadd.f32 %v439_v54, %v435_v53 }
 0x349   : > { %v443_v57 = vmul.f32 0.2, %v441_v55  ;;  %v444_v58 = vmul.f32 0.2, %v442_v56 }
 0x34a   : > { %v452_v59 = vpop.permute.xlu1 %451 }
 0x34b   : > { %v445_v60 = vmax.f32 %v441_v55, %v443_v57  ;;  %v446_v61 = vmax.f32 %v442_v56, %v444_v58 }
 0x34d   : > { %v1627_v62 = vsub.f32 %v445_v60, %v452_v59  ;;  %v1631_v1 = vsub.f32 %v446_v61, %v452_v59  ;;  %v591_v61 = vsub.s32 5, %v1659_v15 }
 0x34e   : > { %v463_v63 = vpop.permute.xlu1 %462 }
 0x34f   : > { %v465_v0 = vadd.f32 %v463_v63, %v1608_v33  ;;  %499 = vrot.lane.b32.xlu0 %v1627_v62, %s1382_s9  ;;  %v592_v19 = vrot.slane %v1666_v20, %v591_v61  ;;  %v596_v22 = vrot.slane %v1668_v21, %v591_v61 }
 0x351   : > { %468 = vperm.xlu1 %1144, %v465_v0  }
 0x352   : > { %v493_v2 = vpop.permute.xlu1 %492 }
 0x353   : > { %584 = vrot.lane.b32.xlu0 %v1631_v1, %s1383_s15 }
 0x355   : > { %471 = vrot.lane.b32.xlu1 %v1627_v62, %s1384_s29 }
 0x356   : > { %1146 = vset.pattern.permute.xlu1 %v1376_v39 }
 0x357   : > { %607 = vrot.lane.b32.xlu0 %v1627_v62, %s1385_s13  ;;  %v518_v3 = vpop.permute.xlu1 %517 }
 0x359   : > { %473 = vrot.lane.b32.xlu1 %v1631_v1, %s1384_s29 }
 0x35b   : > { %675 = vperm.xlu0 %1145, %v1605_v14   ;;  %v1657_v14 = vpop.permute.xlu0 %575 }
 0x35c   : > { %v1651_v4 = vpop.permute.xlu1 %600 }
 0x35d   : > { %501 = vrot.lane.b32.xlu1 %v1631_v1, %s1382_s9 }
 0x35f   : > { %1147 = vset.pattern.permute.xlu0 %v1377_v40  ;;  %v1663_v18 = vpop.permute.xlu0 %650  ;;  %v538_v40 = vrot.slane %v1668_v21, %v533_v23 }
 0x361   : > { %524 = vrot.lane.b32.xlu1 %v1627_v62, %s1386_s19  ;;  %v1653_v5 = vpop.permute.xlu1 %625 }
 0x365   : > { %526 = vrot.lane.b32.xlu1 %v1631_v1, %s1386_s19 }
 0x369   : > { %549 = vrot.lane.b32.xlu1 %v1627_v62, %s1374_s25 }
 0x36d   : > { %551 = vrot.lane.b32.xlu1 %v1631_v1, %s1374_s25 }
 0x371   : > { %582 = vrot.lane.b32.xlu1 %v1627_v62, %s1383_s15 }
 0x375   : > { %609 = vrot.lane.b32.xlu1 %v1631_v1, %s1385_s13 }
 0x379   : > { %632 = vrot.lane.b32.xlu1 %v1627_v62, %s1387_s20 }
 0x37d   : > { %634 = vrot.lane.b32.xlu1 %v1631_v1, %s1387_s20 }
 0x381   : > { %657 = vrot.lane.b32.xlu1 %v1627_v62, %s1388_s1 }
 0x385   : > { %659 = vrot.lane.b32.xlu1 %v1631_v1, %s1388_s1 }
 0x3c1   : > { %v500_v29 = vpop.permute.xlu0 %499 }
 0x3c5   : > { %v585_v60 = vpop.permute.xlu0 %584 }
 0x3cc   : > { %v469_v6 = vpop.permute.xlu1 %468 }
 0x3d0   : > { %v472_v7 = vpop.permute.xlu1 %471 }
 0x3d4   : > { %v474_v9 = vpop.permute.xlu1 %473 }
 0x3d5   : > { %v478_v27 = vsel %vm477_vm3, %v472_v7, %v474_v9  ;;  %v479_v28 = vsel %vm477_vm3, %v474_v9, %v472_v7 }
 0x3d6   : > { %v488_v38 = vmul.f32 %v483_v25, %v479_v28  ;;  %v489_v39 = vmul.f32 %v487_v26, %v478_v27  ;;  %v608_v27 = vpop.permute.xlu0 %607  ;;  %v617_v28 = vrot.slane %v1666_v20, %v616_v12 }
 0x3d8   : > { %v502_v11 = vpop.permute.xlu1 %501  ;;  %v495_v52 = vmul.f32 %v493_v2, %v488_v38  ;;  %v496_v53 = vmul.f32 %v493_v2, %v489_v39  ;;  %v578_v38 = vmul.f32 %v1657_v14, %v1627_v62  ;;  %v579_v39 = vmul.f32 %v1657_v14, %v1631_v1  ;;  %v999_v1 = vld [vmem:[#allocation10 + $0x10] ss:$0 sm:$0xff]  ;;  %v1000_v14 = vld [vmem:[#allocation10 + $0x18] ss:$0 sm:$0xff] }
 0x3d9   : > { %v504_v34 = vsel %vm503_vm4, %v500_v29, %v502_v11  ;;  %v505_v35 = vsel %vm503_vm4, %v502_v11, %v500_v29  ;;  %v621_v29 = vrot.slane %v1668_v21, %v616_v12 }
 0x3da   : > { %v514_v43 = vmul.f32 %v509_v30, %v505_v35  ;;  %v515_v44 = vmul.f32 %v513_v31, %v504_v34  ;;  %v497_v0 = vadd.f32 %v495_v52, %v469_v6  ;;  %v498_v7 = vadd.f32 %v496_v53, %v469_v6 }
 0x3db   : > { %v641_v6 = vsub.s32 7, %v1659_v15 }
 0x3dc   : > { %v525_v13 = vpop.permute.xlu1 %524  ;;  %v520_v56 = vmul.f32 %v518_v3, %v514_v43  ;;  %v521_v57 = vmul.f32 %v518_v3, %v515_v44 }
 0x3dd   : > { %v646_v15 = vrot.slane %v1668_v21, %v641_v6 }
 0x3de   : > { %v523_v2 = vadd.f32 %v521_v57, %v498_v7 }
 0x3e0   : > { %v527_v17 = vpop.permute.xlu1 %526 }
 0x3e1   : > { %v529_v41 = vsel %vm528_vm5, %v525_v13, %v527_v17  ;;  %v530_v42 = vsel %vm528_vm5, %v527_v17, %v525_v13  ;;  %v522_v13 = vadd.f32 %v520_v56, %v497_v0 }
 0x3e2   : > { %v539_v54 = vmul.f32 %v534_v36, %v530_v42  ;;  %v540_v55 = vmul.f32 %v538_v40, %v529_v41  ;;  %v642_v36 = vrot.slane %v1666_v20, %v641_v6 }
 0x3e4   : > { %v550_v24 = vpop.permute.xlu1 %549  ;;  %v545_v9 = vmul.f32 %v543_v8, %v539_v54  ;;  %v546_v11 = vmul.f32 %v543_v8, %v540_v55 }
 0x3e6   : > { %v547_v8 = vadd.f32 %v545_v9, %v522_v13 }
 0x3e8   : > { %v552_v37 = vpop.permute.xlu1 %551 }
 0x3e9   : > { %v554_v47 = vsel %vm553_vm6, %v550_v24, %v552_v37  ;;  %v555_v50 = vsel %vm553_vm6, %v552_v37, %v550_v24  ;;  %v548_v24 = vadd.f32 %v546_v11, %v523_v2 }
 0x3ea   : > { %v564_v58 = vmul.f32 %v559_v45, %v555_v50  ;;  %v565_v59 = vmul.f32 %v563_v46, %v554_v47 }
 0x3ec   : > { %v583_v51 = vpop.permute.xlu1 %582  ;;  %v570_v17 = vmul.f32 %v1655_v10, %v564_v58  ;;  %v571_v3 = vmul.f32 %v1655_v10, %v565_v59  ;;  %v676_v58 = vpop.permute.xlu0 %675 }
 0x3ed   : > { %v587_v25 = vsel %vm586_vm7, %v583_v51, %v585_v60  ;;  %v588_v26 = vsel %vm586_vm7, %v585_v60, %v583_v51 }
 0x3ee   : > { %v572_v10 = vadd.f32 %v570_v17, %v547_v8  ;;  %v573_v30 = vadd.f32 %v571_v3, %v548_v24  ;;  %v597_v34 = vmul.f32 %v592_v19, %v587_v25  ;;  %v598_v35 = vmul.f32 %v596_v22, %v588_v26 }
 0x3f0   : > { %v610_v63 = vpop.permute.xlu1 %609  ;;  %v580_v44 = vadd.f32 %v578_v38, %v572_v10  ;;  %v581_v45 = vadd.f32 %v579_v39, %v573_v30  ;;  %v603_v46 = vmul.f32 %v1651_v4, %v597_v34  ;;  %v604_v47 = vmul.f32 %v1651_v4, %v598_v35 }
 0x3f1   : > { %v612_v31 = vsel %vm611_vm8, %v608_v27, %v610_v63  ;;  %v613_v32 = vsel %vm611_vm8, %v610_v63, %v608_v27 }
 0x3f2   : > { %v622_v42 = vmul.f32 %v617_v28, %v612_v31  ;;  %v623_v43 = vmul.f32 %v621_v29, %v613_v32  ;;  %v605_v52 = vadd.f32 %v603_v46, %v580_v44  ;;  %v606_v53 = vadd.f32 %v604_v47, %v581_v45 }
 0x3f4   : > { %v633_v23 = vpop.permute.xlu1 %632  ;;  %v628_v51 = vmul.f32 %v1653_v5, %v622_v42  ;;  %v629_v62 = vmul.f32 %v1653_v5, %v623_v43 }
 0x3f6   : > { %v630_v59 = vadd.f32 %v628_v51, %v605_v52  ;;  %v631_v60 = vadd.f32 %v629_v62, %v606_v53 }
 0x3f8   : > { %v635_v37 = vpop.permute.xlu1 %634 }
 0x3f9   : > { %v637_v40 = vsel %vm636_vm9, %v633_v23, %v635_v37  ;;  %v638_v41 = vsel %vm636_vm9, %v635_v37, %v633_v23 }
 0x3fa   : > { %v647_v20 = vmul.f32 %v642_v36, %v637_v40  ;;  %v648_v50 = vmul.f32 %v646_v15, %v638_v41 }
 0x3fc   : > { %v658_v21 = vpop.permute.xlu1 %657  ;;  %v653_v54 = vmul.f32 %v1663_v18, %v647_v20  ;;  %v654_v55 = vmul.f32 %v1663_v18, %v648_v50 }
 0x3fe   : > { %v655_v0 = vadd.f32 %v653_v54, %v630_v59  ;;  %v656_v5 = vadd.f32 %v654_v55, %v631_v60 }
 0x400   : > { %v660_v56 = vpop.permute.xlu1 %659 }
 0x401   : > { %v662_v57 = vsel %vm661_vm10, %v658_v21, %v660_v56  ;;  %v663_v4 = vsel %vm661_vm10, %v660_v56, %v658_v21 }
 0x402   : > { %v672_v61 = vmul.f32 %v999_v1, %v662_v57  ;;  %v673_v63 = vmul.f32 %v1000_v14, %v663_v4 }
 0x404   : > { %v678_v7 = vmul.f32 %v676_v58, %v672_v61  ;;  %v679_v16 = vmul.f32 %v676_v58, %v673_v63 }
 0x406   : > { %v680_v9 = vadd.f32 %v678_v7, %v655_v0  ;;  %v681_v11 = vadd.f32 %v679_v16, %v656_v5 }
 0x408   : > { %v682_v12 = vadd.f32 %v681_v11, %v680_v9  ;;  %v695_v13 = vmul.f32 %v680_v9, %v680_v9  ;;  %v696_v2 = vmul.f32 %v681_v11, %v681_v11 }
 0x40a   : > { %683 = vadd.xlane.f32.xlu0 %v682_v12  ;;  %v697_v17 = vadd.f32 %v696_v2, %v695_v13 }
 0x40c   : > { %698 = vadd.xlane.f32.xlu1 %v697_v17 }
 0x493   : > { %v684_v18 = vpop.xlane.xlu0 %683 }
 0x494   : > { %v685_v3 = vrot.slane %v684_v18, 4 }
 0x495   : > { %v699_v19 = vpop.xlane.xlu1 %698 }
 0x496   : > { %v686_v22 = vadd.f32 %v685_v3, %v684_v18  ;;  %v700_v23 = vrot.slane %v699_v19, 4 }
 0x498   : > { %v687_v6 = vrot.slane %v686_v22, 2  ;;  %v701_v8 = vadd.f32 %v700_v23, %v699_v19 }
 0x49a   : > { %v702_v24 = vrot.slane %v701_v8, 2  ;;  %v688_v25 = vadd.f32 %v687_v6, %v686_v22 }
 0x49c   : > { %v689_v26 = vrot.slane %v688_v25, 1  ;;  %v703_v27 = vadd.f32 %v702_v24, %v701_v8 }
 0x49e   : > { %v690_v28 = vadd.f32 %v689_v26, %v688_v25  ;;  %v704_v29 = vrot.slane %v703_v27, 1 }
 0x4a0   : > { %1016 = vpush %v690_v28  ;;  %v705_v10 = vadd.f32 %v704_v29, %v703_v27 }
 0x4a2   : > { %1018 = vpush %v705_v10 }
 0x4d1   : > { %s1017_s28 = spop %1016 }
 0x4d2   : > { %s694_s11 = smul.f32 0.00048828125, %s1017_s28 }
 0x4d3   : > { %s1019_s26 = spop %1018 }
 0x4d4   : > { %s710_s30 = smul.f32 %s694_s11, %s694_s11  ;;  %v718_v35 = vstv %s694_s11 }
 0x4d5   : > { %s709_s7 = smul.f32 0.00048828125, %s1019_s26 }
 0x4d7   : > { %s711_s8 = ssub.f32 %s709_s7, %s710_s30  ;;  %s994_s7 = sshll.u32 %s1573_s12, 4 }
 0x4d9   : > { %s712_s18 = sadd.f32 1e-05, %s711_s8  ;;  %s1009_s8 = sshll.u32 %s1446_s27, 8 }
 0x4da   : > { %s1730_s29 = scalar_lea.hbm %s1773_s6, %s1009_s8  ;;  %s1389_s27 = smov [#allocation11]  }
 0x4db   : > { %v713_v30 = vstv %s712_s18  ;;  %s319_s18 = scalar_lea.vmem [#allocation11], %s994_s7 }
 0x4dc   : > { %1155 = vrsqrt.f32 %v713_v30 }
 0x4e9   : > { %v1156_v31 = vpop.eup %1155 }
 0x4ea   : > { %1020 = vpush %v1156_v31 }
 0x51b   : > { %s1021_s9 = spop %1020 }
 0x51c   : > { %v716_v32 = vstv %s1021_s9  ;;  %s870_s9 = sshll.u32 %s319_s18, 4  ;;  %s871_s9 = int_to_ptr.vmem [resolvable:$true] %s870_s9 }
 0x51d   : > { %v717_v34 = vmul.f32 %v716_v32, %v1608_v33 }
 0x51f   : > { %v719_v36 = vmul.f32 %v718_v35, %v717_v34  ;;  %727 = vperm.xlu1 %1146, %v717_v34  }
 0x521   : > { %721 = vrot.lane.b32.xlu0 %v719_v36, %s1374_s25 }
 0x523   : > { %1149 = vset.pattern.permute.xlu1 %v1380_v49 }
 0x593   : > { %v722_v15 = vpop.permute.xlu0 %721 }
 0x594   : > { %v724_v37 = vsub.f32 %v1608_v33, %v722_v15 }
 0x596   : > { %734 = vperm.xlu0 %1147, %v724_v37  }
 0x59a   : > { %1148 = vset.pattern.permute.xlu0 %v1379_v48  ;;  %v728_v38 = vpop.permute.xlu1 %727  ;;  %v743_v48 = vld [vmem:[%s1770_s3] sm:$0xf] }
 0x59b   : > { %v730_v39 = vmul.f32 %v728_v38, %v680_v9  ;;  %v731_v40 = vmul.f32 %v728_v38, %v681_v11 }
 0x611   : > { %v735_v41 = vpop.permute.xlu0 %734 }
 0x612   : > { %v737_v42 = vadd.f32 %v735_v41, %v730_v39  ;;  %v738_v43 = vadd.f32 %v735_v41, %v731_v40 }
 0x614   : > { %v739_v44 = vmul.f32 0.2, %v737_v42  ;;  %v740_v45 = vmul.f32 0.2, %v738_v43 }
 0x616   : > { %v742_v46 = vmax.f32 %v738_v43, %v740_v45  ;;  %v741_v47 = vmax.f32 %v737_v42, %v739_v44 }
 0x618   : > { %v745_v20 = vpack.c.bf16 %v742_v46, %v742_v46  ;;  %v744_v50 = vpack.c.bf16 %v741_v47, %v741_v47 }
 0x61a   : > { %1001 = vmatprep.subr.msk.bf16.mxu1 %vm338_vm0, %v745_v20  ;;  %v750_v21 = vsel %vm338_vm0, %v744_v50, 0 }
 0x61b   : > { %770 = vmatpush1.bf16.msra.mxu1 %v750_v21 }
 0x61e   : > { %1002 = vmatmul.mubr.msk.bf16.vlgmr.msra.gmra.mxu1 %vm334_vm1, %v743_v48 }
 0x6de   : > { %v789_v51 = vpop.f32.mrf.mxu1 }
 0x6df   : > { %v809_v14 = vmul.f32 %v789_v51, %v789_v51 }
 0x6e0   : > { %v791_v62 = vpop.f32.mrf.mxu1 }
 0x6e1   : > { %v796_v1 = vadd.f32 %v791_v62, %v789_v51  ;;  %v810_v52 = vmul.f32 %v791_v62, %v791_v62 }
 0x6e2   : > { %v793_v53 = vpop.f32.mrf.mxu1 }
 0x6e3   : > { %797 = vadd.xlane.f32.xlu1 %v796_v1  ;;  %v811_v54 = vadd.f32 %v810_v52, %v809_v14 }
 0x6e4   : > { %v794_v55 = vpop.f32.mrf.mxu1 }
 0x6e5   : > { %812 = vadd.xlane.f32.xlu0 %v811_v54 }
 0x76c   : > { %v798_v56 = vpop.xlane.xlu1 %797 }
 0x76d   : > { %v799_v57 = vrot.slane %v798_v56, 4 }
 0x76e   : > { %v813_v4 = vpop.xlane.xlu0 %812 }
 0x76f   : > { %v800_v58 = vadd.f32 %v799_v57, %v798_v56  ;;  %v814_v59 = vrot.slane %v813_v4, 4 }
 0x771   : > { %v801_v60 = vrot.slane %v800_v58, 2  ;;  %v815_v61 = vadd.f32 %v814_v59, %v813_v4 }
 0x773   : > { %v816_v63 = vrot.slane %v815_v61, 2  ;;  %v802_v0 = vadd.f32 %v801_v60, %v800_v58 }
 0x775   : > { %v803_v5 = vrot.slane %v802_v0, 1  ;;  %v817_v7 = vadd.f32 %v816_v63, %v815_v61 }
 0x777   : > { %v804_v16 = vadd.f32 %v803_v5, %v802_v0  ;;  %v818_v9 = vrot.slane %v817_v7, 1 }
 0x779   : > { %1022 = vpush %v804_v16  ;;  %v819_v11 = vadd.f32 %v818_v9, %v817_v7 }
 0x77b   : > { %1024 = vpush %v819_v11 }
 0x7aa   : > { %s1023_s13 = spop %1022 }
 0x7ab   : > { %s808_s19 = smul.f32 0.0006510417, %s1023_s13  ;;  %s856_s13 = scalar_lea.sflag [#allocation4], %s1573_s12 }
 0x7ac   : > { %s1025_s20 = spop %1024 }
 0x7ad   : > { %s824_s1 = smul.f32 %s808_s19, %s808_s19  ;;  %v832_v18 = vstv %s808_s19  ;;  %s1291_s19 = scalar_lea.vmem %s871_s9, 256 }
 0x7ae   : > { %s823_s28 = smul.f32 0.0006510417, %s1025_s20  ;;  %p1292_p1 = scmp.ne.s32.totalorder %s871_s9, %s1291_s19 }
 0x7af   : > { %s1295_s20 = sshll.u32 %s1389_s27, 4  ;;  %s1296_s20 = int_to_ptr.vmem [resolvable:$false] %s1295_s20 }
 0x7b0   : > { %s825_s11 = ssub.f32 %s823_s28, %s824_s1  ;;  %p1293_p4 = pnand %p1292_p1, %p1794_p3 }
 0x7b1   : > { %s1297_s1 = scalar_lea.vmem %s1296_s20, 512  ;;  %p1298_p2 = scmp.lt.s32.totalorder %s871_s9, %s1296_s20 }
 0x7b2   : > { %s826_s26 = sadd.f32 1e-05, %s825_s11  ;;  %p1294_p0 = pneg %p1293_p4 }
 0x7b3   : > { %p1299_p5 = scmp.lt.s32.totalorder %s1297_s1, %s1291_s19 }
 0x7b4   : > { %v827_v12 = vstv %s826_s26 }
 0x7b5   : > { %1157 = vrsqrt.f32 %v827_v12  ;;  %p1300_p11 = por %p1299_p5, %p1298_p2 }
 0x7b7   : > { %p1301_p12 = pnand %p1300_p11, %p1294_p0 }
 0x7c2   : > { %v1158_v13 = vpop.eup %1157 }
 0x7c3   : > { %1026 = vpush %v1158_v13 }
 0x7f4   : > { %s1027_s30 = spop %1026 }
 0x7f5   : > { %v830_v2 = vstv %s1027_s30 }
 0x7f6   : > { %v831_v17 = vmul.f32 %v830_v2, %v1608_v33 }
 0x7f8   : > { %v833_v3 = vmul.f32 %v832_v18, %v831_v17  ;;  %841 = vperm.xlu0 %1148, %v831_v17  }
 0x7fa   : > { %835 = vrot.lane.b32.xlu1 %v833_v3, %s1374_s25 }
 0x7fc   : > { %1150 = vset.pattern.permute.xlu0 %v1380_v49 }
 0x86c   : > { %v836_v19 = vpop.permute.xlu1 %835 }
 0x86d   : > { %v838_v22 = vsub.f32 %v1608_v33, %v836_v19 }
 0x86f   : > { %848 = vperm.xlu1 %1149, %v838_v22  }
 0x873   : > { %v842_v23 = vpop.permute.xlu0 %841 }
 0x874   : > { %v844_v6 = vmul.f32 %v842_v23, %v789_v51  ;;  %v845_v8 = vmul.f32 %v842_v23, %v791_v62 }
 0x8ea   : > { %v849_v24 = vpop.permute.xlu1 %848 }
 0x8eb   : > { %v851_v25 = vadd.f32 %v849_v24, %v844_v6  ;;  %v852_v26 = vadd.f32 %v849_v24, %v845_v8 }
 0x8ed   : > { %853 = vst [vmem:[%s319_s18] sm:$0xff] %v851_v25  ;;  %854 = vst [vmem:[%s319_s18 + $0x8] sm:$0xff] %v852_v26 }
 0x8ee   : > { %1304 = shalt.err (!%p1301_p12)
}
 0x8ef   : > { %s1305_s28 = scalar_lea.hbm %s1730_s29, 256  ;;  %s1309_s26 = scalar_lea.hbm %s1773_s6, 512 }
 0x8f0   : > { %p1306_p13 = scmp.ne.s32.totalorder %s1730_s29, %s1305_s28  ;;  %p1310_p8 = scmp.lt.s32.totalorder %s1730_s29, %s1773_s6 }
 0x8f1   : > { %p1311_p9 = scmp.lt.s32.totalorder %s1309_s26, %s1305_s28 }
 0x8f2   : > { %p1307_p7 = pnand %p1306_p13, %p1794_p3 }
 0x8f3   : > { %p1312_p10 = por %p1311_p9, %p1310_p8 }
 0x8f4   : > { %p1308_p6 = pneg %p1307_p7 }
 0x8f6   : > { %p1313_p1 = pnand %p1312_p10, %p1308_p6 }
 0x8f8   : > { %1316 = shalt.err (!%p1313_p1)
}
 0x8f9   : > { %1046 = dma.vmem_to_hbm [thread:$0]  (%p1794_p3), %s871_s9, 256, %s1730_s29, %s856_s13  }
 0x8fa PF: > { %s882_s8 = sand.u32 1, %s1351_s21   ;;  %p1795_p4 = scmp.ne.s32.totalorder %s1786_s17, 0 }
 0x8fb   : > { %p1796_p0 = scmp.ge.s32.totalorder %s1363_s24, 2  ;;  %s883_s18 = scalar_lea.sflag [#allocation4], %s882_s8 }
 0x8fd   : > { %p1066_p2 = pnand %p1796_p0, %p1795_p4 }
 0x8ff   : > { %p1067_p5 = pneg %p1066_p2 }
 0x901   : > { %1346 = dma.done.wait (%p1067_p5), %s883_s18, 256  }
 0x902   : > { %1348 = vsyncadd (%p1067_p5), %s883_s18, 4294967040  ;;  %p21_p11 = scmp.ge.s32.totalorder %s1510_s10, 4   ;;  %s1797_s21 = smov %s1355_s22 }
 0x903   : > { %s1798_s22 = smov %s1359_s23  ;;  %s1799_s23 = smov %s1521_s14 }
 0x904   : > { %s1800_s24 = smov %s1510_s10  ;;  %23 = sbr.rel (!%p21_p11) target bundleno = 9 (0x9), region = 105 }
 0x909   :  { %888 = vsyncpa [#allocation3], 1 }
 0x90a   :  { %890 = vsyncpa [#allocation3 + $0x1], 1 }
 0x90b   :  { %891 = vsyncpa [#allocation6], 1 }
 0x90c   :  { %892 = vsyncpa [#allocation9], 1 }
 0x90d   :  { %893 = vsyncpa [#allocation4], 1 }
 0x90e   :  { %895 = vsyncpa [#allocation4 + $0x1], 1 }

</bundles_post_ra>
